<compile_context>
chip_gen: v5e
topology: v5e:2x2
jax: 0.10.0
libtpu: 0.0.40
codegen_flags: <defaults>
</compile_context>

<pallas_src>
import functools

import numpy as np
import jax
import jax.numpy as jnp
from jax import lax
from jax.experimental import pallas as pl
from jax.experimental.pallas import tpu as pltpu

BN_EPS = 1e-5
MXU_DTYPE = jnp.bfloat16   # conv-matmul operand dtype; accumulation / epilogue are f32


def _round8(v):
    return -(-v // 8) * 8


# ---------------------------------------------------------------------------
# Kernel
# ---------------------------------------------------------------------------
def _cnn_kernel(x_ref, w_ref, a_ref, o_ref, *, tb, layer_cfgs, head_cfg):
    """Fused forward for TB batch elements (grid axis = batch blocks).

    x_ref : (TB, Cx, Lx) bf16  input block (polyphase-4 split on the fast path)
    w_ref : (Rw, Ww)     bf16  packed conv weights + pool-subsample matrices
    a_ref : (Ra, Wa)     f32   packed [conv bias | bn scale | bn shift] rows + head
    o_ref : (2, TB)      f32   sigmoid(logits) for the TB elements of this step
    """
    head_row, c_last = head_cfg

    # Hoist all parameter loads out of the per-element loop (loaded once per step).
    params = []
    for cfg in layer_cfgs:
        if cfg[0] == "poly4":
            _, C, Co, wr, ar, L4 = cfg
            params.append((w_ref[wr:wr + Co, 0:6 * C], a_ref[ar:ar + Co, 0:3]))
        else:
            _, C, Co, K, s, ps, L, wr, ar, sr, span, Lp = cfg
            S = w_ref[sr:sr + span, 0:Lp] if sr >= 0 else None
            params.append((w_ref[wr:wr + Co, 0:K * C], a_ref[ar:ar + Co, 0:3], S))

    feats = []
    for b in range(tb):
        act = x_ref[b]                                       # (Cx, Lx) bf16
        for cfg, par in zip(layer_cfgs, params):
            if cfg[0] == "poly4":
                # Conv(K=3, stride 2) + ReLU + MaxPool(3, 2) + BN, input given as a
                # 4-phase polyphase split: row t*C + c holds x[c, 4q + t].
                _, C, Co, wr, ar, L4 = cfg
                w1, aff = par
                bias, scale, shift = aff[:, 0:1], aff[:, 1:2], aff[:, 2:3]
                W_e, W_o1, W_o2 = w1[:, 0:3 * C], w1[:, 3 * C:5 * C], w1[:, 5 * C:6 * C]
                # Even / odd strided-conv outputs -- contiguous slices only.
                zE = jnp.dot(W_e, act[0:3 * C, :],
                             preferred_element_type=jnp.float32)             # (Co, L4)
                zO = (jnp.dot(W_o1, act[2 * C:4 * C, 0:L4 - 1],
                              preferred_element_type=jnp.float32)
                      + jnp.dot(W_o2, act[0:C, 1:L4],
                                preferred_element_type=jnp.float32))         # (Co, L4-1)
                zE = jnp.maximum(zE + bias, 0.0)
                zO = jnp.maximum(zO + bias, 0.0)
                Lp = L4 - 1
                m = jnp.maximum(jnp.maximum(zE[:, 0:Lp], zO), zE[:, 1:Lp + 1])
                act = m * scale + shift                                      # (Co, Lp) f32
            else:
                _, C, Co, K, s, ps, L, wr, ar, sr, span, Lp = cfg
                W2, aff, S = par
                bias, scale, shift = aff[:, 0:1], aff[:, 1:2], aff[:, 2:3]
                L_cd = L - K + 1
                ab = act.astype(MXU_DTYPE)
                # Taps folded onto the contraction axis: one MXU matmul per layer.
                xcol = jnp.concatenate([ab[:, k:k + L_cd] for k in range(K)], axis=0)
                y = jnp.dot(W2, xcol, preferred_element_type=jnp.float32)    # (Co, L_cd)
                z = jnp.maximum(y + bias, 0.0)
                # MaxPool of the (possibly strided) conv expressed on dense columns.
                m = z[:, 0:span]
                for j in range(1, K):
                    m = jnp.maximum(m, z[:, j * s:j * s + span])
                if S is not None:
                    # stride-(s*ps) column selection as a bf16 0/1 matmul (f32 acc)
                    m = jnp.dot(m.astype(MXU_DTYPE), S,
                                preferred_element_type=jnp.float32)          # (Co, Lp)
                act = m * scale + shift
            # nn.Dropout after blocks 4/5/6 is identity in eval mode.

        # AdaptiveAvgPool1d(1)
        feats.append(jnp.mean(act, axis=-1, keepdims=True))                  # (C_last, 1)

    fm = feats[0] if tb == 1 else jnp.concatenate(feats, axis=1)             # (C_last, TB)
    Wh = a_ref[head_row:head_row + 2, 0:c_last]                              # (2, C_last)
    bh = a_ref[head_row:head_row + 2, c_last:c_last + 1]                     # (2, 1)
    logits = jnp.dot(Wh, fm, preferred_element_type=jnp.float32) + bh        # (2, TB)
    o_ref[...] = jax.nn.sigmoid(logits).astype(o_ref.dtype)


# ---------------------------------------------------------------------------
# Wrapper
# ---------------------------------------------------------------------------
def cnn_conv1d_forward(x, layers, head_params, strides, pool_strides):
    """Inference forward pass of CNN_conv1D as one fused Pallas TPU kernel."""
    B, C0, L0 = x.shape
    K0 = layers[0]["W"].shape[2]
    s0, ps0 = int(strides[0]), int(pool_strides[0])
    # Fast path: layer-1 conv stride 2 handled via polyphase-4 split of x.
    poly4 = (K0 == 3 and s0 == 2 and ps0 == 2 and L0 % 4 == 0 and L0 >= 8)

    # -------- input preparation (plain XLA, outside the kernel) --------
    if poly4:
        L4 = L0 // 4
        xk = x.reshape(B, C0, L4, 4).transpose(0, 3, 1, 2).reshape(B, 4 * C0, L4)
        Cx, Lx = 4 * C0, L4
        c_in0 = C0
    else:
        c_in0 = _round8(C0)   # zero-pad channels so the fused-contraction path is aligned
        xk = x if c_in0 == C0 else jnp.pad(x, ((0, 0), (0, c_in0 - C0), (0, 0)))
        Cx, Lx = c_in0, L0
    xk = xk.astype(MXU_DTYPE)

    # -------- parameter packing into two canvases --------
    w_list, w_offs, w_cur = [], [], 0
    a_list, a_offs, a_cur = [], [], 0

    def add_w(blk):
        nonlocal w_cur
        off = w_cur
        w_offs.append(off); w_list.append(blk)
        w_cur += _round8(blk.shape[0])
        return off

    def add_a(blk):
        nonlocal a_cur
        off = a_cur
        a_offs.append(off); a_list.append(blk)
        a_cur += _round8(blk.shape[0])
        return off

    layer_cfgs = []
    c_prev, l_cur = C0, L0
    for i, (p, s, ps) in enumerate(zip(layers, strides, pool_strides)):
        s, ps = int(s), int(ps)
        C_out, C_in, K = p["W"].shape
        assert C_in == c_prev, "channel mismatch between layers"
        L_conv = (l_cur - K) // s + 1
        L_pool = (L_conv - K) // ps + 1
        assert L_conv >= 1 and L_pool >= 1, "input length too short for this config"

        # BatchNorm (eval) folded into scale/shift; stack [bias, scale, shift].
        scale = p["gamma"] * lax.rsqrt(p["var"] + BN_EPS)
        shift = p["beta"] - p["mean"] * scale
        ar = add_a(jnp.stack([p["b"], scale, shift], axis=1).astype(jnp.float32))

        if i == 0 and poly4:
            W = p["W"]                                                   # (C_out, C_in, K)
            W_e = jnp.transpose(W, (0, 2, 1)).reshape(C_out, 3 * C_in)   # taps 0..2 / phases 0..2
            W_o1 = jnp.transpose(W[:, :, 0:2], (0, 2, 1)).reshape(C_out, 2 * C_in)
            W_o2 = W[:, :, 2]
            wr = add_w(jnp.concatenate([W_e, W_o1, W_o2], axis=1))       # (C_out, 6*C_in)
            layer_cfgs.append(("poly4", C_in, C_out, wr, ar, L0 // 4))
        else:
            c_eff = c_in0 if i == 0 else C_in
            W = p["W"]
            if c_eff != C_in:
                W = jnp.pad(W, ((0, 0), (0, c_eff - C_in), (0, 0)))
            W2 = jnp.transpose(W, (0, 2, 1)).reshape(C_out, K * c_eff)    # tap-major columns
            wr = add_w(W2)
            st = s * ps
            span = (L_pool - 1) * st + 1
            if span != L_pool:
                S = np.zeros((span, L_pool), np.float32)
                S[np.arange(L_pool) * st, np.arange(L_pool)] = 1.0        # column selection
                sr = add_w(jnp.asarray(S))
            else:
                sr = -1
            layer_cfgs.append(("gen", c_eff, C_out, K, s, ps, l_cur,
                               wr, ar, sr, span, L_pool))

        c_prev, l_cur = C_out, L_pool

    c_last = c_prev
    Wh = head_params["W"].astype(jnp.float32)                  # (2, C_last)
    bh = head_params["b"].reshape(2, 1).astype(jnp.float32)
    head_off = add_a(jnp.concatenate([Wh, bh], axis=1))        # (2, C_last + 1)

    w_width = max(blk.shape[1] for blk in w_list)
    wpack = jnp.zeros((w_cur, w_width), MXU_DTYPE)
    for off, blk in zip(w_offs, w_list):
        wpack = wpack.at[off:off + blk.shape[0], 0:blk.shape[1]].set(blk.astype(MXU_DTYPE))

    a_width = max(blk.shape[1] for blk in a_list)
    apack = jnp.zeros((a_cur, a_width), jnp.float32)
    for off, blk in zip(a_offs, a_list):
        apack = apack.at[off:off + blk.shape[0], 0:blk.shape[1]].set(blk.astype(jnp.float32))

    # -------- batch blocking: prefer >=2 equal grid steps (megacore), TB <= 8 --------
    tb = 1
    for cand in (8, 6, 4, 3, 2):
        if B % cand == 0 and B // cand >= 2:
            tb = cand
            break
    n_steps = B // tb

    kernel = functools.partial(_cnn_kernel, tb=tb,
                               layer_cfgs=tuple(layer_cfgs),
                               head_cfg=(head_off, c_last))
    out = pl.pallas_call(
        kernel,
        out_shape=jax.ShapeDtypeStruct((n_steps, 2, tb), jnp.float32),
        grid=(n_steps,),
        in_specs=[
            pl.BlockSpec((tb, Cx, Lx), lambda i: (i, 0, 0)),
            pl.BlockSpec(wpack.shape, lambda i: (0, 0)),
            pl.BlockSpec(apack.shape, lambda i: (0, 0)),
        ],
        out_specs=pl.BlockSpec((pl.Squeezed(), 2, tb), lambda i: (i, 0, 0)),
        compiler_params=pltpu.CompilerParams(dimension_semantics=("parallel",)),
    )(xk, wpack, apack)
    return out.transpose(0, 2, 1).reshape(B, 2)                # (B, 2)


# ---------------------------------------------------------------------------
# Pure-JAX f32 reference (eval mode) for a tolerance check.
# ---------------------------------------------------------------------------
def reference_forward(x, layers, head_params, strides, pool_strides):
    a = x
    for p, s, ps in zip(layers, strides, pool_strides):
        K = p["W"].shape[2]
        y = lax.conv_general_dilated(
            a, p["W"], window_strides=(int(s),), padding="VALID",
            dimension_numbers=("NCH", "OIH", "NCH"),
            precision=lax.Precision.HIGHEST)
        y = jnp.maximum(y + p["b"][None, :, None], 0.0)
        y = lax.reduce_window(y, -jnp.inf, lax.max, (1, 1, K), (1, 1, int(ps)), "VALID")
        scale = p["gamma"] * lax.rsqrt(p["var"] + BN_EPS)
        shift = p["beta"] - p["mean"] * scale
        a = y * scale[None, :, None] + shift[None, :, None]
    feat = jnp.mean(a, axis=-1)
    return jax.nn.sigmoid(feat @ head_params["W"].T + head_params["b"])


# ---------------------------------------------------------------------------
# Parameter initialization (deterministic, shapes follow the torch module).
# ---------------------------------------------------------------------------
def init_params(key, in_channel, filter_num, filter_size):
    layers = []
    c_prev = in_channel
    for c_out, k in zip(filter_num, filter_size):
        key, k0, k1, k2, k3, k4, k5 = jax.random.split(key, 7)
        layers.append(dict(
            W=0.1 * jax.random.normal(k0, (c_out, c_prev, k), jnp.float32),
            b=0.05 * jax.random.normal(k1, (c_out,), jnp.float32),
            gamma=1.0 + 0.1 * jax.random.normal(k2, (c_out,), jnp.float32),
            beta=0.05 * jax.random.normal(k3, (c_out,), jnp.float32),
            mean=0.1 * jax.random.normal(k4, (c_out,), jnp.float32),
            var=0.9 + 0.2 * jax.random.uniform(k5, (c_out,), jnp.float32),
        ))
        c_prev = c_out
    key, kw, kb = jax.random.split(key, 3)
    head_params = dict(
        W=0.1 * jax.random.normal(kw, (2, filter_num[-1]), jnp.float32),
        b=0.05 * jax.random.normal(kb, (2,), jnp.float32),
    )
    return layers, head_params


if __name__ == "__main__":
    # Config consistent with the module's constructor signature; L=512 is the smallest
    # "nice" length that survives 6 conv(3)+pool(3,2) stages.
    in_channel = 4
    filter_num = [8, 8, 16, 16, 32, 32]
    filter_size = [3, 3, 3, 3, 3, 3]
    strides = [2, 1, 1, 1, 1, 1]
    pool_strides = [2, 2, 2, 2, 2, 2]
    dropout_para = [0.1, 0.1, 0.1]   # identity in eval mode

    B, L = 2, 512
    key = jax.random.PRNGKey(0)
    key, kx, kp = jax.random.split(key, 3)
    x = jax.random.normal(kx, (B, in_channel, L), jnp.float32)
    layers, head_params = init_params(kp, in_channel, filter_num, filter_size)

    fwd = jax.jit(lambda xx, ll, hh: cnn_conv1d_forward(xx, ll, hh, strides, pool_strides))
    out = jax.block_until_ready(fwd(x, layers, head_params))

    ref = reference_forward(x, layers, head_params, strides, pool_strides)

    assert out.shape == (B, 2), out.shape
    assert bool(jnp.all(jnp.isfinite(out)))
    assert bool(jnp.all((out >= 0.0) & (out <= 1.0)))           # sigmoid range
    assert float(jnp.max(jnp.abs(out - ref))) < 5e-2, float(jnp.max(jnp.abs(out - ref)))
    print("KERNEL_OK")
</pallas_src>

<mosaic_0001>
module attributes {stable_mosaic.version = 11 : i64} {
  func.func @_cnn_kernel(%arg0: i32, %arg1: memref<1x16x128xbf16, #tpu.memory_space<vmem>>, %arg2: memref<352x96xbf16, #tpu.memory_space<vmem>>, %arg3: memref<120x33xf32, #tpu.memory_space<vmem>>, %arg4: memref<1x2x1xf32, #tpu.memory_space<vmem>>) attributes {dimension_semantics = [#tpu.dimension_semantics<parallel>], iteration_bounds = array<i64: 2>, scalar_prefetch = 0 : i64, scratch_operands = 0 : i64, tpu.core_type = #tpu.core_type<tc>, window_params = [{transform_indices = @transform_0, window_bounds = array<i64: 1, 16, 128>}, {pipeline_mode = #tpu.pipeline_mode<synchronous>, transform_indices = @transform_1, window_bounds = array<i64: 352, 96>}, {pipeline_mode = #tpu.pipeline_mode<synchronous>, transform_indices = @transform_2, window_bounds = array<i64: 120, 33>}, {transform_indices = @transform_3, window_bounds = array<i64: 1, 2, 1>}]} {
    %c0 = arith.constant 0 : index
    %c0_0 = arith.constant 0 : index
    %0 = vector.load %arg2[%c0, %c0_0] : memref<352x96xbf16, #tpu.memory_space<vmem>>, vector<8x24xbf16>
    %c0_1 = arith.constant 0 : index
    %c0_2 = arith.constant 0 : index
    %1 = vector.load %arg3[%c0_1, %c0_2] : memref<120x33xf32, #tpu.memory_space<vmem>>, vector<8x3xf32>
    %c16 = arith.constant 16 : index
    %c0_3 = arith.constant 0 : index
    %2 = vector.load %arg2[%c16, %c0_3] : memref<352x96xbf16, #tpu.memory_space<vmem>>, vector<123x62xbf16>
    %c8 = arith.constant 8 : index
    %c0_4 = arith.constant 0 : index
    %3 = vector.load %arg2[%c8, %c0_4] : memref<352x96xbf16, #tpu.memory_space<vmem>>, vector<8x24xbf16>
    %c8_5 = arith.constant 8 : index
    %c0_6 = arith.constant 0 : index
    %4 = vector.load %arg3[%c8_5, %c0_6] : memref<120x33xf32, #tpu.memory_space<vmem>>, vector<8x3xf32>
    %c160 = arith.constant 160 : index
    %c0_7 = arith.constant 0 : index
    %5 = vector.load %arg2[%c160, %c0_7] : memref<352x96xbf16, #tpu.memory_space<vmem>>, vector<57x29xbf16>
    %c144 = arith.constant 144 : index
    %c0_8 = arith.constant 0 : index
    %6 = vector.load %arg2[%c144, %c0_8] : memref<352x96xbf16, #tpu.memory_space<vmem>>, vector<16x24xbf16>
    %c16_9 = arith.constant 16 : index
    %c0_10 = arith.constant 0 : index
    %7 = vector.load %arg3[%c16_9, %c0_10] : memref<120x33xf32, #tpu.memory_space<vmem>>, vector<16x3xf32>
    %c240 = arith.constant 240 : index
    %c0_11 = arith.constant 0 : index
    %8 = vector.load %arg2[%c240, %c0_11] : memref<352x96xbf16, #tpu.memory_space<vmem>>, vector<25x13xbf16>
    %c224 = arith.constant 224 : index
    %c0_12 = arith.constant 0 : index
    %9 = vector.load %arg2[%c224, %c0_12] : memref<352x96xbf16, #tpu.memory_space<vmem>>, vector<16x48xbf16>
    %c32 = arith.constant 32 : index
    %c0_13 = arith.constant 0 : index
    %10 = vector.load %arg3[%c32, %c0_13] : memref<120x33xf32, #tpu.memory_space<vmem>>, vector<16x3xf32>
    %c304 = arith.constant 304 : index
    %c0_14 = arith.constant 0 : index
    %11 = vector.load %arg2[%c304, %c0_14] : memref<352x96xbf16, #tpu.memory_space<vmem>>, vector<9x5xbf16>
    %c272 = arith.constant 272 : index
    %c0_15 = arith.constant 0 : index
    %12 = vector.load %arg2[%c272, %c0_15] : memref<352x96xbf16, #tpu.memory_space<vmem>>, vector<32x48xbf16>
    %c48 = arith.constant 48 : index
    %c0_16 = arith.constant 0 : index
    %13 = vector.load %arg3[%c48, %c0_16] : memref<120x33xf32, #tpu.memory_space<vmem>>, vector<32x3xf32>
    %c320 = arith.constant 320 : index
    %c0_17 = arith.constant 0 : index
    %14 = vector.load %arg2[%c320, %c0_17] : memref<352x96xbf16, #tpu.memory_space<vmem>>, vector<32x96xbf16>
    %c80 = arith.constant 80 : index
    %c0_18 = arith.constant 0 : index
    %15 = vector.load %arg3[%c80, %c0_18] : memref<120x33xf32, #tpu.memory_space<vmem>>, vector<32x3xf32>
    %c0_19 = arith.constant 0 : index
    %c0_20 = arith.constant 0 : index
    %c0_21 = arith.constant 0 : index
    %16 = vector.load %arg1[%c0_19, %c0_20, %c0_21] : memref<1x16x128xbf16, #tpu.memory_space<vmem>>, vector<1x16x128xbf16>
    %17 = vector.shape_cast %16 : vector<1x16x128xbf16> to vector<16x128xbf16>
    %18 = vector.extract_strided_slice %1 {offsets = [0, 0], sizes = [8, 1], strides = [1, 1]} : vector<8x3xf32> to vector<8x1xf32>
    %19 = vector.extract_strided_slice %1 {offsets = [0, 1], sizes = [8, 1], strides = [1, 1]} : vector<8x3xf32> to vector<8x1xf32>
    %20 = vector.extract_strided_slice %1 {offsets = [0, 2], sizes = [8, 1], strides = [1, 1]} : vector<8x3xf32> to vector<8x1xf32>
    %21 = vector.extract_strided_slice %0 {offsets = [0, 0], sizes = [8, 12], strides = [1, 1]} : vector<8x24xbf16> to vector<8x12xbf16>
    %22 = vector.extract_strided_slice %0 {offsets = [0, 12], sizes = [8, 8], strides = [1, 1]} : vector<8x24xbf16> to vector<8x8xbf16>
    %23 = vector.extract_strided_slice %0 {offsets = [0, 20], sizes = [8, 4], strides = [1, 1]} : vector<8x24xbf16> to vector<8x4xbf16>
    %24 = vector.extract_strided_slice %17 {offsets = [0, 0], sizes = [12, 128], strides = [1, 1]} : vector<16x128xbf16> to vector<12x128xbf16>
    %cst = arith.constant dense<0.000000e+00> : vector<8x128xf32>
    %25 = tpu.matmul %21, %24, %cst {dimension_numbers = #tpu.dot_dimension_numbers<[1], [0], [0], [1], [0, 0, 1, 1], [], []>} : vector<8x12xbf16>, vector<12x128xbf16>, vector<8x128xf32> -> vector<8x128xf32>
    %26 = vector.extract_strided_slice %17 {offsets = [8, 0], sizes = [8, 127], strides = [1, 1]} : vector<16x128xbf16> to vector<8x127xbf16>
    %cst_22 = arith.constant dense<0.000000e+00> : vector<8x127xf32>
    %27 = tpu.matmul %22, %26, %cst_22 {dimension_numbers = #tpu.dot_dimension_numbers<[1], [0], [0], [1], [0, 0, 1, 1], [], []>} : vector<8x8xbf16>, vector<8x127xbf16>, vector<8x127xf32> -> vector<8x127xf32>
    %28 = vector.extract_strided_slice %17 {offsets = [0, 1], sizes = [4, 127], strides = [1, 1]} : vector<16x128xbf16> to vector<4x127xbf16>
    %cst_23 = arith.constant dense<0.000000e+00> : vector<8x127xf32>
    %29 = tpu.matmul %23, %28, %cst_23 {dimension_numbers = #tpu.dot_dimension_numbers<[1], [0], [0], [1], [0, 0, 1, 1], [], []>} : vector<8x4xbf16>, vector<4x127xbf16>, vector<8x127xf32> -> vector<8x127xf32>
    %30 = arith.addf %27, %29 : vector<8x127xf32>
    %31 = vector.broadcast %18 : vector<8x1xf32> to vector<8x128xf32>
    %32 = arith.addf %25, %31 : vector<8x128xf32>
    %cst_24 = arith.constant 0.000000e+00 : f32
    %33 = vector.broadcast %cst_24 : f32 to vector<8x128xf32>
    %34 = arith.maximumf %32, %33 : vector<8x128xf32>
    %35 = vector.broadcast %18 : vector<8x1xf32> to vector<8x127xf32>
    %36 = arith.addf %30, %35 : vector<8x127xf32>
    %cst_25 = arith.constant 0.000000e+00 : f32
    %37 = vector.broadcast %cst_25 : f32 to vector<8x127xf32>
    %38 = arith.maximumf %36, %37 : vector<8x127xf32>
    %39 = vector.extract_strided_slice %34 {offsets = [0, 0], sizes = [8, 127], strides = [1, 1]} : vector<8x128xf32> to vector<8x127xf32>
    %40 = arith.maximumf %39, %38 : vector<8x127xf32>
    %41 = vector.extract_strided_slice %34 {offsets = [0, 1], sizes = [8, 127], strides = [1, 1]} : vector<8x128xf32> to vector<8x127xf32>
    %42 = arith.maximumf %40, %41 : vector<8x127xf32>
    %43 = vector.broadcast %19 : vector<8x1xf32> to vector<8x127xf32>
    %44 = arith.mulf %42, %43 : vector<8x127xf32>
    %45 = vector.broadcast %20 : vector<8x1xf32> to vector<8x127xf32>
    %46 = arith.addf %44, %45 : vector<8x127xf32>
    %47 = vector.extract_strided_slice %4 {offsets = [0, 0], sizes = [8, 1], strides = [1, 1]} : vector<8x3xf32> to vector<8x1xf32>
    %48 = vector.extract_strided_slice %4 {offsets = [0, 1], sizes = [8, 1], strides = [1, 1]} : vector<8x3xf32> to vector<8x1xf32>
    %49 = vector.extract_strided_slice %4 {offsets = [0, 2], sizes = [8, 1], strides = [1, 1]} : vector<8x3xf32> to vector<8x1xf32>
    %50 = arith.truncf %46 : vector<8x127xf32> to vector<8x127xbf16>
    %51 = vector.extract_strided_slice %50 {offsets = [0, 0], sizes = [8, 125], strides = [1, 1]} : vector<8x127xbf16> to vector<8x125xbf16>
    %52 = vector.extract_strided_slice %50 {offsets = [0, 1], sizes = [8, 125], strides = [1, 1]} : vector<8x127xbf16> to vector<8x125xbf16>
    %53 = vector.extract_strided_slice %50 {offsets = [0, 2], sizes = [8, 125], strides = [1, 1]} : vector<8x127xbf16> to vector<8x125xbf16>
    %54 = tpu.concatenate %51, %52, %53 in 0 : vector<8x125xbf16>, vector<8x125xbf16>, vector<8x125xbf16> -> vector<24x125xbf16>
    %cst_26 = arith.constant dense<0.000000e+00> : vector<8x125xf32>
    %55 = tpu.matmul %3, %54, %cst_26 {dimension_numbers = #tpu.dot_dimension_numbers<[1], [0], [0], [1], [0, 0, 1, 1], [], []>} : vector<8x24xbf16>, vector<24x125xbf16>, vector<8x125xf32> -> vector<8x125xf32>
    %56 = vector.broadcast %47 : vector<8x1xf32> to vector<8x125xf32>
    %57 = arith.addf %55, %56 : vector<8x125xf32>
    %cst_27 = arith.constant 0.000000e+00 : f32
    %58 = vector.broadcast %cst_27 : f32 to vector<8x125xf32>
    %59 = arith.maximumf %57, %58 : vector<8x125xf32>
    %60 = vector.extract_strided_slice %59 {offsets = [0, 0], sizes = [8, 123], strides = [1, 1]} : vector<8x125xf32> to vector<8x123xf32>
    %61 = vector.extract_strided_slice %59 {offsets = [0, 1], sizes = [8, 123], strides = [1, 1]} : vector<8x125xf32> to vector<8x123xf32>
    %62 = arith.maximumf %60, %61 : vector<8x123xf32>
    %63 = vector.extract_strided_slice %59 {offsets = [0, 2], sizes = [8, 123], strides = [1, 1]} : vector<8x125xf32> to vector<8x123xf32>
    %64 = arith.maximumf %62, %63 : vector<8x123xf32>
    %65 = arith.truncf %64 : vector<8x123xf32> to vector<8x123xbf16>
    %cst_28 = arith.constant dense<0.000000e+00> : vector<8x62xf32>
    %66 = tpu.matmul %65, %2, %cst_28 {dimension_numbers = #tpu.dot_dimension_numbers<[1], [0], [0], [1], [0, 0, 1, 1], [], []>} : vector<8x123xbf16>, vector<123x62xbf16>, vector<8x62xf32> -> vector<8x62xf32>
    %67 = vector.broadcast %48 : vector<8x1xf32> to vector<8x62xf32>
    %68 = arith.mulf %66, %67 : vector<8x62xf32>
    %69 = vector.broadcast %49 : vector<8x1xf32> to vector<8x62xf32>
    %70 = arith.addf %68, %69 : vector<8x62xf32>
    %71 = vector.extract_strided_slice %7 {offsets = [0, 0], sizes = [16, 1], strides = [1, 1]} : vector<16x3xf32> to vector<16x1xf32>
    %72 = vector.extract_strided_slice %7 {offsets = [0, 1], sizes = [16, 1], strides = [1, 1]} : vector<16x3xf32> to vector<16x1xf32>
    %73 = vector.extract_strided_slice %7 {offsets = [0, 2], sizes = [16, 1], strides = [1, 1]} : vector<16x3xf32> to vector<16x1xf32>
    %74 = arith.truncf %70 : vector<8x62xf32> to vector<8x62xbf16>
    %75 = vector.extract_strided_slice %74 {offsets = [0, 0], sizes = [8, 60], strides = [1, 1]} : vector<8x62xbf16> to vector<8x60xbf16>
    %76 = vector.extract_strided_slice %74 {offsets = [0, 1], sizes = [8, 60], strides = [1, 1]} : vector<8x62xbf16> to vector<8x60xbf16>
    %77 = vector.extract_strided_slice %74 {offsets = [0, 2], sizes = [8, 60], strides = [1, 1]} : vector<8x62xbf16> to vector<8x60xbf16>
    %78 = tpu.concatenate %75, %76, %77 in 0 : vector<8x60xbf16>, vector<8x60xbf16>, vector<8x60xbf16> -> vector<24x60xbf16>
    %cst_29 = arith.constant dense<0.000000e+00> : vector<16x60xf32>
    %79 = tpu.matmul %6, %78, %cst_29 {dimension_numbers = #tpu.dot_dimension_numbers<[1], [0], [0], [1], [0, 0, 1, 1], [], []>} : vector<16x24xbf16>, vector<24x60xbf16>, vector<16x60xf32> -> vector<16x60xf32>
    %80 = vector.broadcast %71 : vector<16x1xf32> to vector<16x60xf32>
    %81 = arith.addf %79, %80 : vector<16x60xf32>
    %cst_30 = arith.constant 0.000000e+00 : f32
    %82 = vector.broadcast %cst_30 : f32 to vector<16x60xf32>
    %83 = arith.maximumf %81, %82 : vector<16x60xf32>
    %84 = vector.extract_strided_slice %83 {offsets = [0, 0], sizes = [16, 57], strides = [1, 1]} : vector<16x60xf32> to vector<16x57xf32>
    %85 = vector.extract_strided_slice %83 {offsets = [0, 1], sizes = [16, 57], strides = [1, 1]} : vector<16x60xf32> to vector<16x57xf32>
    %86 = arith.maximumf %84, %85 : vector<16x57xf32>
    %87 = vector.extract_strided_slice %83 {offsets = [0, 2], sizes = [16, 57], strides = [1, 1]} : vector<16x60xf32> to vector<16x57xf32>
    %88 = arith.maximumf %86, %87 : vector<16x57xf32>
    %89 = arith.truncf %88 : vector<16x57xf32> to vector<16x57xbf16>
    %cst_31 = arith.constant dense<0.000000e+00> : vector<16x29xf32>
    %90 = tpu.matmul %89, %5, %cst_31 {dimension_numbers = #tpu.dot_dimension_numbers<[1], [0], [0], [1], [0, 0, 1, 1], [], []>} : vector<16x57xbf16>, vector<57x29xbf16>, vector<16x29xf32> -> vector<16x29xf32>
    %91 = vector.broadcast %72 : vector<16x1xf32> to vector<16x29xf32>
    %92 = arith.mulf %90, %91 : vector<16x29xf32>
    %93 = vector.broadcast %73 : vector<16x1xf32> to vector<16x29xf32>
    %94 = arith.addf %92, %93 : vector<16x29xf32>
    %95 = vector.extract_strided_slice %10 {offsets = [0, 0], sizes = [16, 1], strides = [1, 1]} : vector<16x3xf32> to vector<16x1xf32>
    %96 = vector.extract_strided_slice %10 {offsets = [0, 1], sizes = [16, 1], strides = [1, 1]} : vector<16x3xf32> to vector<16x1xf32>
    %97 = vector.extract_strided_slice %10 {offsets = [0, 2], sizes = [16, 1], strides = [1, 1]} : vector<16x3xf32> to vector<16x1xf32>
    %98 = arith.truncf %94 : vector<16x29xf32> to vector<16x29xbf16>
    %99 = vector.extract_strided_slice %98 {offsets = [0, 0], sizes = [16, 27], strides = [1, 1]} : vector<16x29xbf16> to vector<16x27xbf16>
    %100 = vector.extract_strided_slice %98 {offsets = [0, 1], sizes = [16, 27], strides = [1, 1]} : vector<16x29xbf16> to vector<16x27xbf16>
    %101 = vector.extract_strided_slice %98 {offsets = [0, 2], sizes = [16, 27], strides = [1, 1]} : vector<16x29xbf16> to vector<16x27xbf16>
    %102 = tpu.concatenate %99, %100, %101 in 0 : vector<16x27xbf16>, vector<16x27xbf16>, vector<16x27xbf16> -> vector<48x27xbf16>
    %cst_32 = arith.constant dense<0.000000e+00> : vector<16x27xf32>
    %103 = tpu.matmul %9, %102, %cst_32 {dimension_numbers = #tpu.dot_dimension_numbers<[1], [0], [0], [1], [0, 0, 1, 1], [], []>} : vector<16x48xbf16>, vector<48x27xbf16>, vector<16x27xf32> -> vector<16x27xf32>
    %104 = vector.broadcast %95 : vector<16x1xf32> to vector<16x27xf32>
    %105 = arith.addf %103, %104 : vector<16x27xf32>
    %cst_33 = arith.constant 0.000000e+00 : f32
    %106 = vector.broadcast %cst_33 : f32 to vector<16x27xf32>
    %107 = arith.maximumf %105, %106 : vector<16x27xf32>
    %108 = vector.extract_strided_slice %107 {offsets = [0, 0], sizes = [16, 25], strides = [1, 1]} : vector<16x27xf32> to vector<16x25xf32>
    %109 = vector.extract_strided_slice %107 {offsets = [0, 1], sizes = [16, 25], strides = [1, 1]} : vector<16x27xf32> to vector<16x25xf32>
    %110 = arith.maximumf %108, %109 : vector<16x25xf32>
    %111 = vector.extract_strided_slice %107 {offsets = [0, 2], sizes = [16, 25], strides = [1, 1]} : vector<16x27xf32> to vector<16x25xf32>
    %112 = arith.maximumf %110, %111 : vector<16x25xf32>
    %113 = arith.truncf %112 : vector<16x25xf32> to vector<16x25xbf16>
    %cst_34 = arith.constant dense<0.000000e+00> : vector<16x13xf32>
    %114 = tpu.matmul %113, %8, %cst_34 {dimension_numbers = #tpu.dot_dimension_numbers<[1], [0], [0], [1], [0, 0, 1, 1], [], []>} : vector<16x25xbf16>, vector<25x13xbf16>, vector<16x13xf32> -> vector<16x13xf32>
    %115 = vector.broadcast %96 : vector<16x1xf32> to vector<16x13xf32>
    %116 = arith.mulf %114, %115 : vector<16x13xf32>
    %117 = vector.broadcast %97 : vector<16x1xf32> to vector<16x13xf32>
    %118 = arith.addf %116, %117 : vector<16x13xf32>
    %119 = vector.extract_strided_slice %13 {offsets = [0, 0], sizes = [32, 1], strides = [1, 1]} : vector<32x3xf32> to vector<32x1xf32>
    %120 = vector.extract_strided_slice %13 {offsets = [0, 1], sizes = [32, 1], strides = [1, 1]} : vector<32x3xf32> to vector<32x1xf32>
    %121 = vector.extract_strided_slice %13 {offsets = [0, 2], sizes = [32, 1], strides = [1, 1]} : vector<32x3xf32> to vector<32x1xf32>
    %122 = arith.truncf %118 : vector<16x13xf32> to vector<16x13xbf16>
    %123 = vector.extract_strided_slice %122 {offsets = [0, 0], sizes = [16, 11], strides = [1, 1]} : vector<16x13xbf16> to vector<16x11xbf16>
    %124 = vector.extract_strided_slice %122 {offsets = [0, 1], sizes = [16, 11], strides = [1, 1]} : vector<16x13xbf16> to vector<16x11xbf16>
    %125 = vector.extract_strided_slice %122 {offsets = [0, 2], sizes = [16, 11], strides = [1, 1]} : vector<16x13xbf16> to vector<16x11xbf16>
    %126 = tpu.concatenate %123, %124, %125 in 0 : vector<16x11xbf16>, vector<16x11xbf16>, vector<16x11xbf16> -> vector<48x11xbf16>
    %cst_35 = arith.constant dense<0.000000e+00> : vector<32x11xf32>
    %127 = tpu.matmul %12, %126, %cst_35 {dimension_numbers = #tpu.dot_dimension_numbers<[1], [0], [0], [1], [0, 0, 1, 1], [], []>} : vector<32x48xbf16>, vector<48x11xbf16>, vector<32x11xf32> -> vector<32x11xf32>
    %128 = vector.broadcast %119 : vector<32x1xf32> to vector<32x11xf32>
    %129 = arith.addf %127, %128 : vector<32x11xf32>
    %cst_36 = arith.constant 0.000000e+00 : f32
    %130 = vector.broadcast %cst_36 : f32 to vector<32x11xf32>
    %131 = arith.maximumf %129, %130 : vector<32x11xf32>
    %132 = vector.extract_strided_slice %131 {offsets = [0, 0], sizes = [32, 9], strides = [1, 1]} : vector<32x11xf32> to vector<32x9xf32>
    %133 = vector.extract_strided_slice %131 {offsets = [0, 1], sizes = [32, 9], strides = [1, 1]} : vector<32x11xf32> to vector<32x9xf32>
    %134 = arith.maximumf %132, %133 : vector<32x9xf32>
    %135 = vector.extract_strided_slice %131 {offsets = [0, 2], sizes = [32, 9], strides = [1, 1]} : vector<32x11xf32> to vector<32x9xf32>
    %136 = arith.maximumf %134, %135 : vector<32x9xf32>
    %137 = arith.truncf %136 : vector<32x9xf32> to vector<32x9xbf16>
    %cst_37 = arith.constant dense<0.000000e+00> : vector<32x5xf32>
    %138 = tpu.matmul %137, %11, %cst_37 {dimension_numbers = #tpu.dot_dimension_numbers<[1], [0], [0], [1], [0, 0, 1, 1], [], []>} : vector<32x9xbf16>, vector<9x5xbf16>, vector<32x5xf32> -> vector<32x5xf32>
    %139 = vector.broadcast %120 : vector<32x1xf32> to vector<32x5xf32>
    %140 = arith.mulf %138, %139 : vector<32x5xf32>
    %141 = vector.broadcast %121 : vector<32x1xf32> to vector<32x5xf32>
    %142 = arith.addf %140, %141 : vector<32x5xf32>
    %143 = vector.extract_strided_slice %15 {offsets = [0, 0], sizes = [32, 1], strides = [1, 1]} : vector<32x3xf32> to vector<32x1xf32>
    %144 = vector.extract_strided_slice %15 {offsets = [0, 1], sizes = [32, 1], strides = [1, 1]} : vector<32x3xf32> to vector<32x1xf32>
    %145 = vector.extract_strided_slice %15 {offsets = [0, 2], sizes = [32, 1], strides = [1, 1]} : vector<32x3xf32> to vector<32x1xf32>
    %146 = arith.truncf %142 : vector<32x5xf32> to vector<32x5xbf16>
    %147 = vector.extract_strided_slice %146 {offsets = [0, 0], sizes = [32, 3], strides = [1, 1]} : vector<32x5xbf16> to vector<32x3xbf16>
    %148 = vector.extract_strided_slice %146 {offsets = [0, 1], sizes = [32, 3], strides = [1, 1]} : vector<32x5xbf16> to vector<32x3xbf16>
    %149 = vector.extract_strided_slice %146 {offsets = [0, 2], sizes = [32, 3], strides = [1, 1]} : vector<32x5xbf16> to vector<32x3xbf16>
    %150 = tpu.concatenate %147, %148, %149 in 0 : vector<32x3xbf16>, vector<32x3xbf16>, vector<32x3xbf16> -> vector<96x3xbf16>
    %cst_38 = arith.constant dense<0.000000e+00> : vector<32x3xf32>
    %151 = tpu.matmul %14, %150, %cst_38 {dimension_numbers = #tpu.dot_dimension_numbers<[1], [0], [0], [1], [0, 0, 1, 1], [], []>} : vector<32x96xbf16>, vector<96x3xbf16>, vector<32x3xf32> -> vector<32x3xf32>
    %152 = vector.broadcast %143 : vector<32x1xf32> to vector<32x3xf32>
    %153 = arith.addf %151, %152 : vector<32x3xf32>
    %cst_39 = arith.constant 0.000000e+00 : f32
    %154 = vector.broadcast %cst_39 : f32 to vector<32x3xf32>
    %155 = arith.maximumf %153, %154 : vector<32x3xf32>
    %156 = vector.extract_strided_slice %155 {offsets = [0, 0], sizes = [32, 1], strides = [1, 1]} : vector<32x3xf32> to vector<32x1xf32>
    %157 = vector.extract_strided_slice %155 {offsets = [0, 1], sizes = [32, 1], strides = [1, 1]} : vector<32x3xf32> to vector<32x1xf32>
    %158 = arith.maximumf %156, %157 : vector<32x1xf32>
    %159 = vector.extract_strided_slice %155 {offsets = [0, 2], sizes = [32, 1], strides = [1, 1]} : vector<32x3xf32> to vector<32x1xf32>
    %160 = arith.maximumf %158, %159 : vector<32x1xf32>
    %161 = arith.mulf %160, %144 : vector<32x1xf32>
    %162 = arith.addf %161, %145 : vector<32x1xf32>
    %cst_40 = arith.constant dense<0.000000e+00> : vector<32xf32>
    %163 = vector.multi_reduction <add>, %162, %cst_40 [1] : vector<32x1xf32> to vector<32xf32>
    %164 = vector.shape_cast %163 : vector<32xf32> to vector<32x1xf32>
    %cst_41 = arith.constant 1.000000e+00 : f32
    %165 = vector.broadcast %cst_41 : f32 to vector<32x1xf32>
    %166 = arith.divf %164, %165 : vector<32x1xf32>
    %c112 = arith.constant 112 : index
    %c0_42 = arith.constant 0 : index
    %167 = vector.load %arg3[%c112, %c0_42] : memref<120x33xf32, #tpu.memory_space<vmem>>, vector<2x32xf32>
    %c112_43 = arith.constant 112 : index
    %c32_44 = arith.constant 32 : index
    %168 = vector.load %arg3[%c112_43, %c32_44] : memref<120x33xf32, #tpu.memory_space<vmem>>, vector<2x1xf32>
    %cst_45 = arith.constant dense<0.000000e+00> : vector<2x1xf32>
    %169 = tpu.matmul %167, %166, %cst_45 {dimension_numbers = #tpu.dot_dimension_numbers<[1], [0], [0], [1], [0, 0, 1, 1], [], []>} : vector<2x32xf32>, vector<32x1xf32>, vector<2x1xf32> -> vector<2x1xf32>
    %170 = arith.addf %169, %168 : vector<2x1xf32>
    %171 = arith.negf %170 : vector<2x1xf32>
    %172 = math.exp %171 : vector<2x1xf32>
    %cst_46 = arith.constant 1.000000e+00 : f32
    %173 = vector.broadcast %cst_46 : f32 to vector<2x1xf32>
    %174 = arith.addf %173, %172 : vector<2x1xf32>
    %175 = arith.divf %173, %174 : vector<2x1xf32>
    %c0_47 = arith.constant 0 : index
    %c0_48 = arith.constant 0 : index
    %c0_49 = arith.constant 0 : index
    %176 = vector.load %arg4[%c0_47, %c0_48, %c0_49] : memref<1x2x1xf32, #tpu.memory_space<vmem>>, vector<1x2x1xf32>
    %177 = vector.shape_cast %176 : vector<1x2x1xf32> to vector<2x1xf32>
    %178 = vector.shape_cast %175 : vector<2x1xf32> to vector<1x2x1xf32>
    tpu.vector_store %arg4[%c0_47, %c0_48, %c0_49], %178 {strides = array<i32>} : memref<1x2x1xf32, #tpu.memory_space<vmem>>, vector<1x2x1xf32>,
    return
  }
  func.func @transform_0(%arg0: i32) -> (i32, i32, i32) {
    %c0_i32 = arith.constant 0 : i32
    %c0_i32_0 = arith.constant 0 : i32
    %c0_i32_1 = arith.constant 0 : i32
    return %arg0, %c0_i32, %c0_i32_0 : i32, i32, i32
  }
  func.func @transform_1(%arg0: i32) -> (i32, i32) {
    %c0_i32 = arith.constant 0 : i32
    %c0_i32_0 = arith.constant 0 : i32
    %c0_i32_1 = arith.constant 0 : i32
    return %c0_i32, %c0_i32_0 : i32, i32
  }
  func.func @transform_2(%arg0: i32) -> (i32, i32) {
    %c0_i32 = arith.constant 0 : i32
    %c0_i32_0 = arith.constant 0 : i32
    %c0_i32_1 = arith.constant 0 : i32
    return %c0_i32, %c0_i32_0 : i32, i32
  }
  func.func @transform_3(%arg0: i32) -> (i32, i32, i32) {
    %c0_i32 = arith.constant 0 : i32
    %c0_i32_0 = arith.constant 0 : i32
    %c0_i32_1 = arith.constant 0 : i32
    return %arg0, %c0_i32, %c0_i32_0 : i32, i32, i32
  }
}

</mosaic_0001>

<bundles_post_ra>
// kernel: _lambda_.1
= control target key start
LH: loop header
LB: loop body
LE: loop exit
PB: predicated region body
PF: predicated region fallthrough
CT: control target
= control target key end

     0   :  { %s1428_s12 = smov 0   ;;  %s1662_s0 = inlined_call_operand.vmem [shape: bf16[2,16,128], index: 0, kind: input, shape index: {}]   ;;  %s1663_s1 = inlined_call_operand.vmem [shape: bf16[352,96], index: 1, kind: input, shape index: {}]   ;;  %s1664_s2 = inlined_call_operand.vmem [shape: f32[120,33], index: 2, kind: input, shape index: {}]   ;;  %s1665_s3 = inlined_call_operand.vmem [shape: f32[2,2,1], index: 3, kind: output, shape index: {}]  }
   0x1 LB: > { %s1161_s13 = sadd.s32 4294967295, %s1397_s12   ;;  %p1165_p0 = scmp.ge.s32.totalorder %s1397_s12, 1  ;;  %s1397_s12 = sphi %s1428_s12, %s13_s12  }
   0x2   : > { %p137_p1 = scmp.lt.s32.totalorder %s1397_s12, 3 }
   0x4   : > { %p138_p2 = pnand %p1165_p0, %p137_p1 }
   0x5   : > { %p160_p3 = scmp.lt.s32.totalorder (!%p138_p2), %s1161_s13, 1  ;;  %s1400_s17 = smov (!%p138_p2), 116  }
   0x6   : > { %141 = sbr.rel (%p138_p2) target bundleno = 2994 (0xbb2), region = 32  ;;  %s1401_s23 = smov (!%p138_p2), 127  }
   0x7   : > { %s1402_s24 = smov (!%p138_p2), 108   ;;  %s1405_s25 = smov (!%p138_p2), 126  }
   0xb   : > { %v170_v0 = vld [vmem:[%s1663_s1] sm:$0xf]  ;;  %s1667_s13 = smov (!%p160_p3, %s1161_s13), 1  ;;  %v1399_v2 = vmov 0   ;;  %vm267_vm0 = vcmask 1043456   ;;  %vm296_vm1 = vcmask 1045504  }
   0xc   : > { %v231_v1 = vunpack.c.l.b16 %v170_v0  ;;  %1317 = vset.pattern.permute.xlu1 %v1399_v2  ;;  %s1272_s16 = sshll.u32 %s1667_s13, 3  ;;  %v171_v11 = vld [vmem:[%s1664_s2] sm:$0xff]  ;;  %vm292_vm2 = vcmask 97280   ;;  %v1403_v13 = vmov 2   ;;  %vm263_vm3 = vcmask 64512   ;;  %v189_v41 = vld [vmem:[%s1664_s2 + $0x8] sm:$0xff] }
   0xd   : > { %s164_s20 = scalar_lea.vmem %s1662_s0, %s1272_s16  ;;  %1319 = vset.pattern.permute.xlu0 %v1403_v13  ;;  %vm244_vm4 = vcmask 1041408   ;;  %v1404_v15 = vmov 1   ;;  %vm240_vm5 = vcmask 31744   ;;  %v188_v46 = vld [vmem:[%s1663_s1 + $0x4] sm:$0xf]  ;;  %vm349_vm6 = vcmask 195584  }
   0xe   : > { %v232_v3 = vpack.c.b16 %v231_v1, %v231_v1  ;;  %v228_v4 = vld [vmem:[%s164_s20] sm:$0xf]  ;;  %v229_v5 = vld [vmem:[%s164_s20 + $0x4] sm:$0xf]  ;;  %1318 = vset.pattern.permute.xlu2 %v1404_v15  ;;  %vm431_vm7 = vcmask 1044480   ;;  %v1406_v47 = vmov 65535  }
   0xf   : > { %v236_v6 = vunpack.c.l.b16 %v228_v4  ;;  %v290_v7 = vunpack.c.l.b16 %v229_v5  ;;  %v269_v8 = vsel %vm267_vm0, %v229_v5, 0  ;;  %v432_v48 = vsel %vm431_vm7, 4294967295, %v1406_v47  ;;  %v1203_v50 = vld [vmem:[%s1663_s1 + $0x40] sm:$0xf]  ;;  %v1280_v51 = vld [vmem:[%s1663_s1 + $0x40] sm:$0x30] }
  0x10   : > { %261 = vrot.lane.b32.xlu1 %v232_v3, %s1400_s17  ;;  %278 = vmatpush.bf16.msra.mxu1 %v269_v8  ;;  %v433_v49 = vsel %vm296_vm1, %v432_v48, 0  ;;  %v1204_v52 = vor.u32 %v1280_v51, %v1203_v50  ;;  %v1279_v59 = vld [vmem:[%s1663_s1 + $0x38] sm:$0xff]  ;;  %v1278_v60 = vld [vmem:[%s1663_s1 + $0x30] sm:$0xff]  ;;  %v1277_v61 = vld [vmem:[%s1663_s1 + $0x28] sm:$0xff]  ;;  %vm427_vm8 = vcmask 1006592   ;;  %vm551_vm9 = vcmask 465920  }
  0x11   : > { %v237_v9 = vpack.c.b16 %v236_v6, %v236_v6  ;;  %v291_v10 = vpack.c.b16 %v290_v7, %v236_v6  ;;  %v1276_v62 = vld [vmem:[%s1663_s1 + $0x20] sm:$0xff]  ;;  %v1275_v63 = vld [vmem:[%s1663_s1 + $0x18] sm:$0xff]  ;;  %v1273_v1 = vld [vmem:[%s1663_s1 + $0x8] sm:$0xff]  ;;  %vm623_vm10 = vcmask 392192   ;;  %vm673_vm11 = vcmask 203776  }
  0x12   : > { %v435_v53 = vand.u32 %v1204_v52, %v433_v49  ;;  %vm830_vm12 = vcmask 72704   ;;  %vm957_vm13 = vcmask 785408   ;;  %vm1064_vm14 = vcmask 261120  }
  0x13   : > { %238 = vrot.lane.b32.xlu0 %v237_v9, %s1401_s23  ;;  %v298_v12 = vsel %vm296_vm1, %v291_v10, 0 }
  0x14   : > { %307 = vmatpush.bf16.msra.mxu2 %v298_v12 }
  0x17   : > { %1171 = vmatmul.msk.bf16.vlgmr.msra.gmra.mxu2 %vm292_vm2, %v170_v0  ;;  %v1274_v0 = vld [vmem:[%s1663_s1 + $0x10] sm:$0xff]  ;;  %vm1106_vm2 = vcmask 1024  }
  0x18   : > { %286 = vperm.xlu1 %1317, %v171_v11  }
  0x1b   : > { %233 = vrot.lane.b32.xlu0 %v232_v3, %s1402_s24 }
  0x23   : > { %328 = vperm.xlu0 %1319, %v171_v11  }
  0x2b   : > { %1323 = vset.pattern.permute.xlu0 %v1399_v2 }
  0x82   : > { %v262_v14 = vpop.permute.xlu1 %261 }
  0x83   : > { %1170 = vmatmul.msk.bf16.vlgmr.msra.gmra.mxu1 %vm263_vm3, %v262_v14 }
  0x85   : > { %v239_v16 = vpop.permute.xlu0 %238 }
  0x86   : > { %v246_v17 = vsel %vm244_vm4, %v239_v16, 0 }
  0x87   : > { %255 = vmatpush.bf16.msra.mxu0 %v246_v17 }
  0x8a   : > { %v287_v19 = vpop.permute.xlu1 %286 }
  0x8b   : > { %437 = vmatpush.bf16.msrb.mxu0 %v435_v53 }
  0x8d   : > { %v234_v18 = vpop.permute.xlu0 %233 }
  0x8e   : > { %1169 = vmatmul.msk.bf16.vlgmr.msra.gmra.mxu0 %vm240_vm5, %v234_v18 }
  0x8f   : > { %438 = vmatpush.bf16.msrb.mxu0 %v1279_v59 }
  0x93   : > { %439 = vmatpush.bf16.msrb.mxu0 %v1278_v60 }
  0x95   : > { %v329_v35 = vpop.permute.xlu0 %328 }
  0x97   : > { %440 = vmatpush.bf16.msrb.mxu0 %v1277_v61 }
  0x9a   : > { %v309_v20 = vpop.f32.mrf.mxu2 }
  0x9b   : > { %v310_v21 = vadd.f32 %v309_v20, %v287_v19  ;;  %441 = vmatpush.bf16.msrb.mxu0 %v1276_v62  ;;  %v200_v20 = vld [vmem:[%s1664_s2 + $0x10] sm:$0xff] }
  0x9d   : > { %v313_v22 = vmax.f32 %v310_v21, 0.0 }
  0x9f   : > { %318 = vrot.lane.b32.xlu2 %v313_v22, %s1401_s23  ;;  %442 = vmatpush.bf16.msrb.mxu0 %v1275_v63 }
  0xa2   : > { %v311_v23 = vpop.f32.mrf.mxu2 }
  0xa3   : > { %443 = vmatpush.bf16.msrb.mxu0 %v1274_v0 }
  0xa7   : > { %323 = vperm.xlu2 %1318, %v171_v11   ;;  %444 = vmatpush.bf16.msrb.mxu0 %v1273_v1 }
  0xaf   : > { %1321 = vset.pattern.permute.xlu2 %v1403_v13 }
  0xf9   : > { %v319_v26 = vpop.permute.xlu2 %318 }
 0x100   : > { %v280_v24 = vpop.f32.mrf.mxu1 }
 0x101   : > { %v324_v33 = vpop.permute.xlu2 %323 }
 0x108   : > { %v282_v25 = vpop.f32.mrf.mxu1 }
 0x109   : > { %v1285_v25 = vld [vmem:[%s1663_s1 + $0x48] sm:$0xff] }
 0x10b   : > { %v257_v27 = vpop.f32.mrf.mxu0 }
 0x10c   : > { %v281_v28 = vadd.f32 %v280_v24, %v257_v27 }
 0x10e   : > { %v314_v29 = vadd.f32 %v287_v19, %v281_v28  ;;  %v201_v19 = vld [vmem:[%s1664_s2 + $0x18] sm:$0xff] }
 0x110   : > { %v315_v30 = vmax.f32 %v314_v29, 0.0 }
 0x112   : > { %v316_v31 = vmax.f32 %v313_v22, %v315_v30 }
 0x113   : > { %v259_v32 = vpop.f32.mrf.mxu0 }
 0x114   : > { %v321_v34 = vmax.f32 %v316_v31, %v319_v26 }
 0x116   : > { %v326_v36 = vmul.f32 %v324_v33, %v321_v34 }
 0x118   : > { %v331_v37 = vadd.f32 %v329_v35, %v326_v36  ;;  %v1225_v35 = vld [vmem:[%s1663_s1 + $0x68] sm:$0xf]  ;;  %v1284_v36 = vld [vmem:[%s1663_s1 + $0x68] sm:$0x10] }
 0x11a   : > { %v332_v38 = vpack.c.bf16 %v331_v37, %v331_v37  ;;  %v1239_v37 = vld [vmem:[%s1663_s1 + $0x80] sm:$0xf] }
 0x11c   : > { %v334_v39 = vunpack.c.l.b16 %v332_v38 }
 0x11e   : > { %v335_v40 = vpack.c.b16 %v334_v39, %v334_v39  ;;  %v1226_v39 = vor.u32 %v1284_v36, %v1225_v35 }
 0x120   : > { %336 = vrot.lane.b32.xlu2 %v335_v40, %s1401_s23  ;;  %338 = vrot.lane.b32.xlu1 %v335_v40, %s1405_s25  ;;  %v555_v40 = vsel %vm267_vm0, 4294967295, %v1406_v47  ;;  %v1281_v47 = vld [vmem:[%s1663_s1 + $0x50] sm:$0xff] }
 0x128   : > { %346 = vperm.xlu1 %1317, %v189_v41  }
 0x130   : > { %1320 = vset.pattern.permute.xlu1 %v1404_v15 }
 0x131   : > { %451 = vperm.xlu1 %1320, %v189_v41  }
 0x17a   : > { %v337_v44 = vpop.permute.xlu2 %336 }
 0x17b   : > { %v342_v45 = vsel %vm267_vm0, %v332_v38, %v337_v44  ;;  %v1287_v38 = vld [vmem:[%s1663_s1 + $0x80] sm:$0x10] }
 0x192   : > { %v339_v42 = vpop.permute.xlu1 %338 }
 0x193   : > { %v354_v43 = vsel %vm267_vm0, %v339_v42, 0  ;;  %v556_v42 = vsel %vm431_vm7, %v555_v40, 0 }
 0x194   : > { %362 = vmatpush.bf16.msra.mxu3 %v354_v43  ;;  %v558_v43 = vand.u32 %v1226_v39, %v556_v42 }
 0x196   : > { %564 = vmatpush.bf16.msrb.mxu2 %v558_v43 }
 0x198   : > { %363 = vmatpush.bf16.msra.mxu3 %v342_v45  ;;  %v1283_v45 = vld [vmem:[%s1663_s1 + $0x60] sm:$0xff] }
 0x19a   : > { %v347_v54 = vpop.permute.xlu1 %346  ;;  %565 = vmatpush.bf16.msrb.mxu2 %v1283_v45 }
 0x19b   : > { %1172 = vmatmul.msk.bf16.vlgmr.msra.gmra.mxu3 %vm349_vm6, %v188_v46  ;;  %v1282_v46 = vld [vmem:[%s1663_s1 + $0x58] sm:$0xff] }
 0x19e   : > { %566 = vmatpush.bf16.msrb.mxu2 %v1282_v46 }
 0x1a2   : > { %567 = vmatpush.bf16.msrb.mxu2 %v1281_v47 }
 0x1a3   : > { %v452_v8 = vpop.permute.xlu1 %451 }
 0x21e   : > { %v365_v55 = vpop.f32.mrf.mxu3 }
 0x21f   : > { %v366_v56 = vadd.f32 %v365_v55, %v347_v54 }
 0x221   : > { %v369_v57 = vmax.f32 %v366_v56, 0.0 }
 0x223   : > { %375 = vrot.lane.b32.xlu0 %v369_v57, %s1405_s25  ;;  %371 = vrot.lane.b32.xlu2 %v369_v57, %s1401_s23 }
 0x226   : > { %v367_v58 = vpop.f32.mrf.mxu3 }
 0x22b   : > { %456 = vperm.xlu2 %1321, %v189_v41   ;;  %v1240_v41 = vor.u32 %v1287_v38, %v1239_v37 }
 0x22d   : > { %v678_v44 = vand.u32 %v1240_v41, %v556_v42 }
 0x233   : > { %1322 = vset.pattern.permute.xlu2 %v1399_v2 }
 0x234   : > { %474 = vperm.xlu2 %1322, %v200_v20  }
 0x23c   : > { %1334 = vset.pattern.permute.xlu2 %v1404_v15 }
 0x27d   : > { %v372_v3 = vpop.permute.xlu2 %371 }
 0x27e   : > { %v374_v4 = vmax.f32 %v369_v57, %v372_v3 }
 0x285   : > { %v457_v10 = vpop.permute.xlu2 %456 }
 0x28e   : > { %v475_v27 = vpop.permute.xlu2 %474 }
 0x295   : > { %v376_v5 = vpop.permute.xlu0 %375 }
 0x296   : > { %v378_v6 = vmax.f32 %v374_v4, %v376_v5 }
 0x298   : > { %v379_v7 = vpack.c.bf16 %v378_v6, %v378_v6 }
 0x29a   : > { %1205 = vmatmul.msk.bf16.vlgmr.msrb.gmra.mxu0 %vm427_vm8, %v379_v7 }
 0x317   : > { %v446_v9 = vpop.f32.mrf.mxu0 }
 0x318   : > { %v454_v11 = vmul.f32 %v452_v8, %v446_v9 }
 0x31a   : > { %v459_v12 = vadd.f32 %v457_v10, %v454_v11 }
 0x31c   : > { %v460_v14 = vpack.c.bf16 %v459_v12, %v459_v12  ;;  %v209_v12 = vld [vmem:[%s1664_s2 + $0x28] sm:$0xff] }
 0x31e   : > { %v462_v16 = vunpack.c.l.b16 %v460_v14 }
 0x31f   : > { %v448_v17 = vpop.f32.mrf.mxu0 }
 0x320   : > { %v463_v18 = vpack.c.b16 %v462_v16, %v462_v16  ;;  %v1254_v16 = vld [vmem:[%s1663_s1 + $0x98] sm:$0xf]  ;;  %v1289_v17 = vld [vmem:[%s1663_s1 + $0x98] sm:$0x10] }
 0x322   : > { %464 = vrot.lane.b32.xlu1 %v463_v18, %s1401_s23  ;;  %466 = vrot.lane.b32.xlu0 %v463_v18, %s1405_s25  ;;  %v1255_v18 = vor.u32 %v1289_v17, %v1254_v16 }
 0x32a   : > { %479 = vperm.xlu0 %1323, %v201_v19  }
 0x332   : > { %1335 = vset.pattern.permute.xlu0 %v1403_v13 }
 0x333   : > { %585 = vperm.xlu0 %1335, %v200_v20  }
 0x33b   : > { %1338 = vset.pattern.permute.xlu0 %v1399_v2 }
 0x33c   : > { %615 = vperm.xlu0 %1338, %v209_v12  }
 0x344   : > { %1351 = vset.pattern.permute.xlu0 %v1403_v13 }
 0x394   : > { %v467_v21 = vpop.permute.xlu0 %466  ;;  %v465_v23 = vpop.permute.xlu1 %464 }
 0x395   : > { %v491_v22 = vsel %vm267_vm0, %v467_v21, 0  ;;  %v470_v24 = vsel %vm267_vm0, %v460_v14, %v465_v23  ;;  %v208_v14 = vld [vmem:[%s1664_s2 + $0x20] sm:$0xff]  ;;  %v1288_v21 = vld [vmem:[%s1663_s1 + $0x70] sm:$0xff] }
 0x396   : > { %499 = vmatpush.bf16.msrb.mxu1 %v491_v22  ;;  %705 = vperm.xlu0 %1351, %v208_v14  }
 0x39a   : > { %500 = vmatpush.bf16.msrb.mxu1 %v470_v24 }
 0x39c   : > { %v480_v28 = vpop.permute.xlu0 %479 }
 0x39d   : > { %1210 = vmatmul.msk.bf16.vlgmr.msrb.gmra.mxu1 %vm349_vm6, %v1285_v25 }
 0x39e   : > { %686 = vmatpush.bf16.msra.mxu1 %v678_v44  ;;  %1354 = vset.pattern.permute.xlu0 %v1399_v2 }
 0x3a5   : > { %v586_v62 = vpop.permute.xlu0 %585 }
 0x3ae   : > { %v616_v24 = vpop.permute.xlu0 %615 }
 0x408   : > { %v706_v46 = vpop.permute.xlu0 %705 }
 0x41a   : > { %v502_v26 = vpop.f32.mrf.mxu1 }
 0x41b   : > { %v503_v29 = vadd.f32 %v502_v26, %v475_v27 }
 0x41d   : > { %v507_v32 = vmax.f32 %v503_v29, 0.0 }
 0x422   : > { %v504_v30 = vpop.f32.mrf.mxu1 }
 0x423   : > { %v505_v31 = vadd.f32 %v504_v30, %v480_v28 }
 0x425   : > { %v508_v33 = vmax.f32 %v505_v31, 0.0  ;;  %v1286_v31 = vld [vmem:[%s1663_s1 + $0x78] sm:$0xff] }
 0x426   : > { %687 = vmatpush.bf16.msra.mxu1 %v1286_v31 }
 0x427   : > { %v1329_v34 = vpack.i.bf16 %v508_v33, %v507_v32 }
 0x429   : > { %1330 = vrot.lane.b32.xlu2 %v1329_v34, %s1405_s25  ;;  %1325 = vrot.lane.b32.xlu1 %v1329_v34, %s1401_s23 }
 0x431   : > { %575 = vperm.xlu1 %1320, %v200_v20   ;;  %579 = vperm.xlu2 %1334, %v201_v19   ;;  %v838_v20 = vand.u32 %v1255_v18, %v556_v42 }
 0x439   : > { %1336 = vset.pattern.permute.xlu1 %v1403_v13  ;;  %1337 = vset.pattern.permute.xlu2 %v1399_v2 }
 0x43a   : > { %589 = vperm.xlu1 %1336, %v201_v19  }
 0x442   : > { %1349 = vset.pattern.permute.xlu1 %v1404_v15 }
 0x483   : > { %v1331_v48 = vpop.permute.xlu2 %1330 }
 0x484   : > { %v1333_v52 = vunpack.i.h.bf16 %v1331_v48  ;;  %v1332_v53 = vunpack.i.l.bf16 %v1331_v48 }
 0x48b   : > { %v580_v63 = vpop.permute.xlu2 %579 }
 0x49b   : > { %v1326_v49 = vpop.permute.xlu1 %1325 }
 0x49c   : > { %v1328_v50 = vunpack.i.h.bf16 %v1326_v49  ;;  %v1327_v51 = vunpack.i.l.bf16 %v1326_v49 }
 0x49e   : > { %v518_v54 = vmax.f32 %v508_v33, %v1328_v50  ;;  %v517_v55 = vmax.f32 %v507_v32, %v1327_v51 }
 0x4a0   : > { %v526_v56 = vmax.f32 %v518_v54, %v1333_v52  ;;  %v525_v57 = vmax.f32 %v517_v55, %v1332_v53 }
 0x4a2   : > { %v527_v58 = vpack.c.bf16 %v526_v56, %v525_v57 }
 0x4a3   : > { %v576_v59 = vpop.permute.xlu1 %575 }
 0x4a4   : > { %1227 = vmatmul.msk.bf16.vlgmr.msrb.gmra.mxu2 %vm551_vm9, %v527_v58 }
 0x4ac   : > { %v590_v3 = vpop.permute.xlu1 %589 }
 0x527   : > { %v569_v60 = vpop.f32.mrf.mxu2 }
 0x528   : > { %v582_v61 = vmul.f32 %v576_v59, %v569_v60  ;;  %v217_v59 = vld [vmem:[%s1664_s2 + $0x38] sm:$0xff]  ;;  %v218_v60 = vld [vmem:[%s1664_s2 + $0x40] sm:$0xff] }
 0x529   : > { %735 = vperm.xlu0 %1354, %v217_v59  }
 0x52a   : > { %v592_v0 = vadd.f32 %v586_v62, %v582_v61  ;;  %v216_v61 = vld [vmem:[%s1664_s2 + $0x30] sm:$0xff]  ;;  %v219_v62 = vld [vmem:[%s1664_s2 + $0x48] sm:$0xff] }
 0x52c   : > { %v594_v5 = vpack.c.bf16 %v592_v0, %v592_v0  ;;  %v1290_v0 = vld [vmem:[%s1663_s1 + $0x88] sm:$0xff] }
 0x52e   : > { %v598_v8 = vunpack.c.l.b16 %v594_v5 }
 0x52f   : > { %v571_v1 = vpop.f32.mrf.mxu2 }
 0x530   : > { %v583_v4 = vmul.f32 %v580_v63, %v571_v1  ;;  %v1291_v1 = vld [vmem:[%s1663_s1 + $0x90] sm:$0xff] }
 0x531   : > { %1377 = vset.pattern.permute.xlu0 %v1404_v15 }
 0x532   : > { %v593_v6 = vadd.f32 %v590_v3, %v583_v4 }
 0x534   : > { %v595_v7 = vpack.c.bf16 %v593_v6, %v593_v6 }
 0x536   : > { %v599_v9 = vunpack.c.l.b16 %v595_v7 }
 0x538   : > { %v600_v10 = vpack.c.b16 %v599_v9, %v598_v8 }
 0x53a   : > { %602 = vrot.lane.b32.xlu1 %v600_v10, %s1401_s23  ;;  %605 = vrot.lane.b32.xlu2 %v600_v10, %s1405_s25 }
 0x542   : > { %610 = vperm.xlu2 %1337, %v208_v14  }
 0x54a   : > { %1350 = vset.pattern.permute.xlu2 %v1404_v15 }
 0x594   : > { %v606_v11 = vpop.permute.xlu2 %605 }
 0x595   : > { %632 = vmatpush.bf16.msrb.mxu3 %v606_v11 }
 0x59b   : > { %v736_v5 = vpop.permute.xlu0 %735 }
 0x59c   : > { %v611_v23 = vpop.permute.xlu2 %610 }
 0x5ac   : > { %v603_v19 = vpop.permute.xlu1 %602 }
 0x5ad   : > { %633 = vmatpush.bf16.msrb.mxu3 %v603_v19 }
 0x5b1   : > { %634 = vmatpush.bf16.msrb.mxu3 %v600_v10 }
 0x5b4   : > { %1232 = vmatmul.msk.bf16.vlgmr.msrb.gmra.mxu3 %vm623_vm10, %v1288_v21 }
 0x5b5   : > { %847 = vmatpush.bf16.msra.mxu3 %v838_v20 }
 0x637   : > { %v636_v22 = vpop.f32.mrf.mxu3 }
 0x638   : > { %v637_v25 = vadd.f32 %v636_v22, %v611_v23 }
 0x63a   : > { %v641_v28 = vmax.f32 %v637_v25, 0.0 }
 0x63f   : > { %v638_v26 = vpop.f32.mrf.mxu3 }
 0x640   : > { %v639_v27 = vadd.f32 %v638_v26, %v616_v24 }
 0x642   : > { %v642_v29 = vmax.f32 %v639_v27, 0.0 }
 0x644   : > { %v1344_v30 = vpack.i.bf16 %v642_v29, %v641_v28 }
 0x646   : > { %1345 = vrot.lane.b32.xlu2 %v1344_v30, %s1405_s25  ;;  %1340 = vrot.lane.b32.xlu1 %v1344_v30, %s1401_s23 }
 0x64e   : > { %695 = vperm.xlu1 %1349, %v208_v14   ;;  %699 = vperm.xlu2 %1350, %v209_v12  }
 0x656   : > { %1352 = vset.pattern.permute.xlu1 %v1403_v13  ;;  %1353 = vset.pattern.permute.xlu2 %v1399_v2 }
 0x657   : > { %709 = vperm.xlu1 %1352, %v209_v12  }
 0x65f   : > { %1355 = vset.pattern.permute.xlu1 %v1399_v2 }
 0x6a0   : > { %v1346_v32 = vpop.permute.xlu2 %1345 }
 0x6a1   : > { %v1348_v36 = vunpack.i.h.bf16 %v1346_v32  ;;  %v1347_v37 = vunpack.i.l.bf16 %v1346_v32 }
 0x6a8   : > { %v700_v47 = vpop.permute.xlu2 %699 }
 0x6b8   : > { %v1341_v33 = vpop.permute.xlu1 %1340 }
 0x6b9   : > { %v1343_v34 = vunpack.i.h.bf16 %v1341_v33  ;;  %v1342_v35 = vunpack.i.l.bf16 %v1341_v33 }
 0x6bb   : > { %v652_v38 = vmax.f32 %v642_v29, %v1343_v34  ;;  %v651_v39 = vmax.f32 %v641_v28, %v1342_v35 }
 0x6bd   : > { %v660_v40 = vmax.f32 %v652_v38, %v1348_v36  ;;  %v659_v41 = vmax.f32 %v651_v39, %v1347_v37 }
 0x6bf   : > { %v661_v42 = vpack.c.bf16 %v660_v40, %v659_v41 }
 0x6c0   : > { %v696_v43 = vpop.permute.xlu1 %695 }
 0x6c1   : > { %1241 = vmatmul.msk.bf16.vlgmr.msra.gmra.mxu1 %vm673_vm11, %v661_v42 }
 0x6c9   : > { %v710_v50 = vpop.permute.xlu1 %709 }
 0x73e   : > { %v689_v44 = vpop.f32.mrf.mxu1 }
 0x73f   : > { %v702_v45 = vmul.f32 %v696_v43, %v689_v44 }
 0x741   : > { %v712_v48 = vadd.f32 %v706_v46, %v702_v45 }
 0x743   : > { %v714_v52 = vpack.c.bf16 %v712_v48, %v712_v48 }
 0x745   : > { %v718_v55 = vunpack.c.l.b16 %v714_v52 }
 0x746   : > { %v691_v49 = vpop.f32.mrf.mxu1 }
 0x747   : > { %v703_v51 = vmul.f32 %v700_v47, %v691_v49 }
 0x749   : > { %v713_v53 = vadd.f32 %v710_v50, %v703_v51 }
 0x74b   : > { %v715_v54 = vpack.c.bf16 %v713_v53, %v713_v53 }
 0x74d   : > { %v719_v56 = vunpack.c.l.b16 %v715_v54 }
 0x74f   : > { %v720_v57 = vpack.c.b16 %v719_v56, %v718_v55 }
 0x751   : > { %722 = vrot.lane.b32.xlu1 %v720_v57, %s1401_s23  ;;  %725 = vrot.lane.b32.xlu2 %v720_v57, %s1405_s25 }
 0x759   : > { %740 = vperm.xlu1 %1355, %v218_v60   ;;  %730 = vperm.xlu2 %1353, %v216_v61  }
 0x761   : > { %1378 = vset.pattern.permute.xlu1 %v1403_v13  ;;  %745 = vperm.xlu2 %1353, %v219_v62  }
 0x769   : > { %1376 = vset.pattern.permute.xlu2 %v1404_v15 }
 0x7ab   : > { %v726_v58 = vpop.permute.xlu2 %725 }
 0x7ac   : > { %769 = vmatpush.bf16.msra.mxu2 %v726_v58 }
 0x7b3   : > { %v731_v4 = vpop.permute.xlu2 %730 }
 0x7bb   : > { %v746_v17 = vpop.permute.xlu2 %745 }
 0x7c3   : > { %v723_v63 = vpop.permute.xlu1 %722 }
 0x7c4   : > { %770 = vmatpush.bf16.msra.mxu2 %v723_v63 }
 0x7c8   : > { %771 = vmatpush.bf16.msra.mxu2 %v720_v57 }
 0x7cb   : > { %1250 = vmatmul.msk.bf16.vlgmr.msra.gmra.mxu2 %vm623_vm10, %v1290_v0  ;;  %v741_v14 = vpop.permute.xlu1 %740 }
 0x7db   : > { %1251 = vmatmul.msk.bf16.gmra.mxu2 %vm623_vm10, %v1291_v1 }
 0x84e   : > { %v773_v3 = vpop.f32.mrf.mxu2 }
 0x84f   : > { %v774_v6 = vadd.f32 %v773_v3, %v731_v4 }
 0x851   : > { %v783_v9 = vmax.f32 %v774_v6, 0.0 }
 0x856   : > { %v775_v7 = vpop.f32.mrf.mxu2 }
 0x857   : > { %v776_v8 = vadd.f32 %v775_v7, %v736_v5 }
 0x859   : > { %v784_v10 = vmax.f32 %v776_v8, 0.0 }
 0x85b   : > { %v1361_v11 = vpack.i.bf16 %v784_v10, %v783_v9 }
 0x85d   : > { %1362 = vrot.lane.b32.xlu2 %v1361_v11, %s1405_s25  ;;  %1357 = vrot.lane.b32.xlu1 %v1361_v11, %s1401_s23  ;;  %v226_v11 = vld [vmem:[%s1664_s2 + $0x60] sm:$0xff] }
 0x85e   : > { %v778_v12 = vpop.f32.mrf.mxu2 }
 0x85f   : > { %v779_v16 = vadd.f32 %v778_v12, %v741_v14  ;;  %v224_v14 = vld [vmem:[%s1664_s2 + $0x50] sm:$0xff] }
 0x861   : > { %v785_v20 = vmax.f32 %v779_v16, 0.0 }
 0x865   : > { %868 = vperm.xlu2 %1376, %v218_v60  }
 0x866   : > { %v780_v18 = vpop.f32.mrf.mxu2 }
 0x867   : > { %v781_v19 = vadd.f32 %v780_v18, %v746_v17 }
 0x869   : > { %v786_v21 = vmax.f32 %v781_v19, 0.0  ;;  %v1292_v19 = vld [vmem:[%s1663_s1 + $0xa0] sm:$0xff] }
 0x86b   : > { %v1366_v22 = vpack.i.bf16 %v786_v21, %v785_v20 }
 0x86d   : > { %1367 = vrot.lane.b32.xlu0 %v1366_v22, %s1401_s23  ;;  %1372 = vrot.lane.b32.xlu1 %v1366_v22, %s1405_s25 }
 0x86e   : > { %1379 = vset.pattern.permute.xlu2 %v1403_v13 }
 0x86f   : > { %892 = vperm.xlu2 %1379, %v219_v62  }
 0x875   : > { %888 = vperm.xlu1 %1378, %v218_v60   ;;  %872 = vperm.xlu0 %1377, %v219_v62  }
 0x877   : > { %1381 = vset.pattern.permute.xlu2 %v1404_v15 }
 0x878   : > { %864 = vperm.xlu2 %1381, %v217_v59  }
 0x87d   : > { %1380 = vset.pattern.permute.xlu1 %v1404_v15  ;;  %1382 = vset.pattern.permute.xlu0 %v1403_v13 }
 0x87e   : > { %860 = vperm.xlu1 %1380, %v216_v61   ;;  %880 = vperm.xlu0 %1382, %v216_v61  }
 0x880   : > { %1385 = vset.pattern.permute.xlu2 %v1399_v2 }
 0x886   : > { %1383 = vset.pattern.permute.xlu1 %v1403_v13  ;;  %1386 = vset.pattern.permute.xlu0 %v1399_v2 }
 0x887   : > { %884 = vperm.xlu1 %1383, %v217_v59  }
 0x88f   : > { %1384 = vset.pattern.permute.xlu1 %v1399_v2 }
 0x8b7   : > { %v1363_v23 = vpop.permute.xlu2 %1362 }
 0x8b8   : > { %v1365_v27 = vunpack.i.h.bf16 %v1363_v23  ;;  %v1364_v28 = vunpack.i.l.bf16 %v1363_v23 }
 0x8bf   : > { %v869_v42 = vpop.permute.xlu2 %868 }
 0x8c9   : > { %v893_v45 = vpop.permute.xlu2 %892 }
 0x8cf   : > { %v1358_v24 = vpop.permute.xlu1 %1357 }
 0x8d0   : > { %v1360_v25 = vunpack.i.h.bf16 %v1358_v24  ;;  %v1359_v26 = vunpack.i.l.bf16 %v1358_v24 }
 0x8d2   : > { %v804_v15 = vmax.f32 %v784_v10, %v1360_v25  ;;  %v803_v29 = vmax.f32 %v783_v9, %v1359_v26  ;;  %v865_v50 = vpop.permute.xlu2 %864  ;;  %v227_v9 = vld [vmem:[%s1664_s2 + $0x68] sm:$0xff]  ;;  %v225_v10 = vld [vmem:[%s1664_s2 + $0x58] sm:$0xff] }
 0x8d4   : > { %v820_v30 = vmax.f32 %v804_v15, %v1365_v27  ;;  %v819_v31 = vmax.f32 %v803_v29, %v1364_v28 }
 0x8d6   : > { %v823_v32 = vpack.c.bf16 %v820_v30, %v819_v31 }
 0x8d8   : > { %1256 = vmatmul.msk.bf16.vlgmr.msra.gmra.mxu3 %vm830_vm12, %v823_v32 }
 0x8df   : > { %v1373_v33 = vpop.permute.xlu1 %1372  ;;  %v1368_v13 = vpop.permute.xlu0 %1367 }
 0x8e0   : > { %v1370_v34 = vunpack.i.h.bf16 %v1368_v13  ;;  %v1369_v35 = vunpack.i.l.bf16 %v1368_v13  ;;  %v1375_v36 = vunpack.i.h.bf16 %v1373_v33  ;;  %v1374_v37 = vunpack.i.l.bf16 %v1373_v33 }
 0x8e2   : > { %v806_v2 = vmax.f32 %v786_v21, %v1370_v34  ;;  %v805_v38 = vmax.f32 %v785_v20, %v1369_v35  ;;  %v1293_v20 = vld [vmem:[%s1663_s1 + $0xa8] sm:$0xff] }
 0x8e4   : > { %v822_v39 = vmax.f32 %v806_v2, %v1375_v36  ;;  %v821_v40 = vmax.f32 %v805_v38, %v1374_v37 }
 0x8e6   : > { %v824_v41 = vpack.c.bf16 %v822_v39, %v821_v40 }
 0x8e7   : > { %v889_v43 = vpop.permute.xlu1 %888  ;;  %v873_v44 = vpop.permute.xlu0 %872 }
 0x8e8   : > { %1257 = vmatmul.msk.bf16.gmra.mxu3 %vm830_vm12, %v824_v41 }
 0x8f0   : > { %v861_v46 = vpop.permute.xlu1 %860  ;;  %v881_v49 = vpop.permute.xlu0 %880 }
 0x8f9   : > { %v885_v53 = vpop.permute.xlu1 %884 }
 0x95b   : > { %v849_v47 = vpop.f32.mrf.mxu3 }
 0x95c   : > { %v875_v48 = vmul.f32 %v861_v46, %v849_v47  ;;  %v1059_v46 = vld [vmem:[%s1664_s2 + $0x70] sm:$0x3] }
 0x95e   : > { %v895_v51 = vadd.f32 %v881_v49, %v875_v48 }
 0x960   : > { %v899_v55 = vpack.c.bf16 %v895_v51, %v895_v51 }
 0x962   : > { %v907_v58 = vunpack.c.l.b16 %v899_v55 }
 0x963   : > { %v851_v52 = vpop.f32.mrf.mxu3 }
 0x964   : > { %v876_v54 = vmul.f32 %v865_v50, %v851_v52 }
 0x966   : > { %v896_v56 = vadd.f32 %v885_v53, %v876_v54 }
 0x968   : > { %v900_v57 = vpack.c.bf16 %v896_v56, %v896_v56 }
 0x96a   : > { %v908_v59 = vunpack.c.l.b16 %v900_v57 }
 0x96b   : > { %v854_v60 = vpop.f32.mrf.mxu3 }
 0x96c   : > { %v911_v61 = vpack.c.b16 %v908_v59, %v907_v58  ;;  %v877_v62 = vmul.f32 %v869_v42, %v854_v60 }
 0x96e   : > { %915 = vrot.lane.b32.xlu0 %v911_v61, %s1401_s23  ;;  %921 = vrot.lane.b32.xlu1 %v911_v61, %s1405_s25  ;;  %v897_v63 = vadd.f32 %v889_v43, %v877_v62 }
 0x970   : > { %v901_v3 = vpack.c.bf16 %v897_v63, %v897_v63 }
 0x972   : > { %v909_v6 = vunpack.c.l.b16 %v901_v3 }
 0x973   : > { %v856_v0 = vpop.f32.mrf.mxu3 }
 0x974   : > { %v878_v1 = vmul.f32 %v873_v44, %v856_v0 }
 0x976   : > { %v898_v4 = vadd.f32 %v893_v45, %v878_v1  ;;  %944 = vperm.xlu1 %1384, %v227_v9   ;;  %934 = vperm.xlu0 %1386, %v225_v10  }
 0x978   : > { %v902_v5 = vpack.c.bf16 %v898_v4, %v898_v4 }
 0x97a   : > { %v910_v7 = vunpack.c.l.b16 %v902_v5 }
 0x97c   : > { %v912_v8 = vpack.c.b16 %v910_v7, %v909_v6 }
 0x97e   : > { %923 = vrot.lane.b32.xlu2 %v912_v8, %s1405_s25  ;;  %929 = vperm.xlu1 %1384, %v224_v14  }
 0x97f   : > { %1045 = vrot.lane.b32.xlu0 %v227_v9, %s1405_s25 }
 0x986   : > { %917 = vrot.lane.b32.xlu2 %v912_v8, %s1401_s23 }
 0x987   : > { %1043 = vrot.lane.b32.xlu0 %v226_v11, %s1405_s25 }
 0x98e   : > { %939 = vperm.xlu2 %1385, %v226_v11  }
 0x996   : > { %1029 = vrot.lane.b32.xlu2 %v227_v9, %s1401_s23 }
 0x99e   : > { %1027 = vrot.lane.b32.xlu2 %v226_v11, %s1401_s23 }
 0x9a6   : > { %1025 = vrot.lane.b32.xlu2 %v225_v10, %s1401_s23 }
 0x9d8   : > { %v924_v12 = vpop.permute.xlu2 %923 }
 0x9d9   : > { %966 = vmatpush.bf16.msra.mxu0 %v924_v12  ;;  %1294 = vmatpush.bf16.msrb.mxu1 %v924_v12 }
 0x9e0   : > { %v922_v16 = vpop.permute.xlu1 %921  ;;  %v918_v17 = vpop.permute.xlu2 %917 }
 0x9e1   : > { %967 = vmatpush.bf16.msra.mxu0 %v922_v16  ;;  %1295 = vmatpush.bf16.msrb.mxu1 %v922_v16  ;;  %v916_v18 = vpop.permute.xlu0 %915 }
 0x9e5   : > { %968 = vmatpush.bf16.msra.mxu0 %v918_v17  ;;  %1296 = vmatpush.bf16.msrb.mxu1 %v918_v17 }
 0x9e8   : > { %v945_v21 = vpop.permute.xlu1 %944  ;;  %v940_v23 = vpop.permute.xlu2 %939 }
 0x9e9   : > { %969 = vmatpush.bf16.msra.mxu0 %v916_v18  ;;  %1297 = vmatpush.bf16.msrb.mxu1 %v916_v18  ;;  %v935_v29 = vpop.permute.xlu0 %934 }
 0x9ed   : > { %970 = vmatpush.bf16.msra.mxu0 %v912_v8  ;;  %1298 = vmatpush.bf16.msrb.mxu1 %v912_v8 }
 0x9f0   : > { %v930_v22 = vpop.permute.xlu1 %929  ;;  %v1030_v35 = vpop.permute.xlu2 %1029 }
 0x9f1   : > { %971 = vmatpush.bf16.msra.mxu0 %v911_v61  ;;  %1299 = vmatpush.bf16.msrb.mxu1 %v911_v61  ;;  %v1046_v38 = vpop.permute.xlu0 %1045 }
 0x9f4   : > { %1266 = vmatmul.msk.bf16.vlgmr.msra.gmra.mxu0 %vm957_vm13, %v1292_v19  ;;  %1267 = vmatmul.msk.bf16.vlgmr.msrb.gmra.mxu1 %vm957_vm13, %v1293_v20 }
 0x9f8   : > { %v1028_v36 = vpop.permute.xlu2 %1027 }
 0x9f9   : > { %v1044_v45 = vpop.permute.xlu0 %1043 }
 0xa00   : > { %v1026_v37 = vpop.permute.xlu2 %1025 }
 0xa71   : > { %v973_v24 = vpop.f32.mrf.mxu0  ;;  %v978_v25 = vpop.f32.mrf.mxu1 }
 0xa72   : > { %v974_v26 = vadd.f32 %v973_v24, %v930_v22  ;;  %v979_v27 = vadd.f32 %v978_v25, %v940_v23 }
 0xa74   : > { %v983_v28 = vmax.f32 %v974_v26, 0.0  ;;  %v985_v15 = vmax.f32 %v979_v27, 0.0 }
 0xa76   : > { %991 = vrot.lane.b32.xlu0 %v983_v28, %s1401_s23  ;;  %995 = vrot.lane.b32.xlu1 %v985_v15, %s1401_s23 }
 0xa79   : > { %v975_v30 = vpop.f32.mrf.mxu0  ;;  %v980_v31 = vpop.f32.mrf.mxu1 }
 0xa7a   : > { %v976_v32 = vadd.f32 %v975_v30, %v935_v29  ;;  %v981_v33 = vadd.f32 %v980_v31, %v945_v21 }
 0xa7c   : > { %v984_v13 = vmax.f32 %v976_v32, 0.0  ;;  %v986_v34 = vmax.f32 %v981_v33, 0.0 }
 0xa7e   : > { %997 = vrot.lane.b32.xlu2 %v986_v34, %s1401_s23  ;;  %993 = vrot.lane.b32.xlu0 %v984_v13, %s1401_s23 }
 0xa7f   : > { %1011 = vrot.lane.b32.xlu1 %v985_v15, %s1405_s25 }
 0xa86   : > { %1013 = vrot.lane.b32.xlu2 %v986_v34, %s1405_s25  ;;  %1039 = vrot.lane.b32.xlu0 %v224_v14, %s1405_s25 }
 0xa87   : > { %1007 = vrot.lane.b32.xlu1 %v983_v28, %s1405_s25 }
 0xa8e   : > { %1041 = vrot.lane.b32.xlu2 %v225_v10, %s1405_s25 }
 0xa8f   : > { %1009 = vrot.lane.b32.xlu1 %v984_v13, %s1405_s25  ;;  %s1407_s25 = smov 96  }
 0xa97   : > { %1023 = vrot.lane.b32.xlu1 %v224_v14, %s1401_s23  ;;  %s1168_s23 = sshll.u32 %s1667_s13, 1 }
 0xa98   : > { %s168_s14 = scalar_lea.vmem %s1665_s3, %s1168_s23 }
 0xa9f   : > { %1061 = vrot.lane.b32.xlu1 %v1059_v46, %s1407_s25 }
 0xad8   : > { %v998_v2 = vpop.permute.xlu2 %997 }
 0xad9   : > { %v1006_v39 = vmax.f32 %v986_v34, %v998_v2 }
 0xae0   : > { %v1014_v40 = vpop.permute.xlu2 %1013 }
 0xae1   : > { %v1022_v41 = vmax.f32 %v1006_v39, %v1014_v40 }
 0xae3   : > { %v1038_v42 = vmul.f32 %v1030_v35, %v1022_v41 }
 0xae5   : > { %v1054_v43 = vadd.f32 %v1046_v38, %v1038_v42 }
 0xae7   : > { %1079 = vmatpush.msrb.mxu2 %v1054_v43 }
 0xae8   : > { %v996_v44 = vpop.permute.xlu1 %995  ;;  %v992_v50 = vpop.permute.xlu0 %991 }
 0xae9   : > { %v1005_v47 = vmax.f32 %v985_v15, %v996_v44  ;;  %v1042_v58 = vpop.permute.xlu2 %1041  ;;  %v1003_v60 = vmax.f32 %v983_v28, %v992_v50 }
 0xaf0   : > { %v994_v54 = vpop.permute.xlu0 %993 }
 0xaf1   : > { %v1012_v48 = vpop.permute.xlu1 %1011  ;;  %v1004_v55 = vmax.f32 %v984_v13, %v994_v54 }
 0xaf2   : > { %v1021_v49 = vmax.f32 %v1005_v47, %v1012_v48 }
 0xaf4   : > { %v1037_v51 = vmul.f32 %v1028_v36, %v1021_v49 }
 0xaf6   : > { %v1053_v52 = vadd.f32 %v1044_v45, %v1037_v51 }
 0xaf8   : > { %1080 = vmatpush.msrb.mxu2 %v1053_v52  ;;  %v1040_v0 = vpop.permute.xlu0 %1039 }
 0xaf9   : > { %v1008_v53 = vpop.permute.xlu1 %1007 }
 0xafa   : > { %v1019_v62 = vmax.f32 %v1003_v60, %v1008_v53 }
 0xb01   : > { %v1010_v56 = vpop.permute.xlu1 %1009 }
 0xb02   : > { %v1020_v57 = vmax.f32 %v1004_v55, %v1010_v56 }
 0xb04   : > { %v1036_v59 = vmul.f32 %v1026_v37, %v1020_v57 }
 0xb06   : > { %v1052_v61 = vadd.f32 %v1042_v58, %v1036_v59 }
 0xb08   : > { %1081 = vmatpush.msrb.mxu2 %v1052_v61 }
 0xb09   : > { %v1024_v63 = vpop.permute.xlu1 %1023 }
 0xb0a   : > { %v1035_v1 = vmul.f32 %v1024_v63, %v1019_v62 }
 0xb0c   : > { %v1051_v3 = vadd.f32 %v1040_v0, %v1035_v1 }
 0xb0e   : > { %1082 = vmatpush.msrb.mxu2 %v1051_v3 }
 0xb0f   : > { %1268 = vmatmul.msk.f32.vlgmr.msrb.gmra.mxu2 %vm1064_vm14, %v1059_v46 }
 0xb11   : > { %v1062_v4 = vpop.permute.xlu1 %1061 }
 0xb92   : > { %v1084_v5 = vpop.f32.mrf.mxu2 }
 0xb93   : > { %v1085_v6 = vadd.f32 %v1084_v5, %v1062_v4 }
 0xb95   : > { %v1269_v7 = vmul.f32 -1.442695, %v1085_v6 }
 0xb97   : > { %1387 = vpow2.f32 %v1269_v7 }
 0xb9d   : > { %v1388_v8 = vpop.eup %1387 }
 0xb9e   : > { %v1090_v9 = vadd.f32 1.0, %v1388_v8 }
 0xba0   : > { %1389 = vrcp.f32 %v1090_v9  ;;  %v1102_v14 = vand.u32 2147483648, %v1090_v9  ;;  %v1100_v17 = vand.u32 2147483647, %v1090_v9  ;;  %vm1096_vm0 = vweird.f32 %v1090_v9 }
 0xba2   : > { %v1103_v19 = vor.u32 1.1754944e-38, %v1102_v14  ;;  %vm1101_vm3 = vcmp.eq.f32.partialorder %v1100_v17, 8.507059e+37 }
 0xba6   : > { %v1390_v10 = vpop.eup %1389 }
 0xba7   : > { %v1092_v11 = vmul.f32 %v1390_v10, %v1090_v9  ;;  %vm1097_vm15 = vweird.f32 %v1390_v10 }
 0xba8   : > { %vm1098_vm1 = vmor %vm1096_vm0, %vm1097_vm15 }
 0xba9   : > { %v1093_v12 = vsub.f32 1.0, %v1092_v11 }
 0xbab   : > { %v1094_v16 = vmul.f32 %v1390_v10, %v1093_v12 }
 0xbad   : > { %v1095_v18 = vadd.f32 %v1390_v10, %v1094_v16 }
 0xbaf   : > { %v1099_v20 = vsel %vm1098_vm1, %v1390_v10, %v1095_v18 }
 0xbb0   : > { %v1104_v21 = vsel %vm1101_vm3, %v1103_v19, %v1099_v20 }
 0xbb1   : > { %1107 = vst.msk [vmem:[%s168_s14] sm:$0x3] %vm1106_vm2, %v1104_v21 }
 0xbb2 PF: > { %s13_s12 = sadd.s32 1, %s1397_s12  }
 0xbb3   : > { %p10_p4 = scmp.ge.s32.totalorder %s13_s12, 4  }
 0xbb5   :  { %12 = sbr.rel (!%p10_p4) target bundleno = 1 (0x1), region = 62 }

</bundles_post_ra>
